<compile_context>
chip_gen: v6e
topology: v6e:2x2x1
jax: 0.10.0
libtpu: 0.0.40
codegen_flags: <defaults>
</compile_context>

<pallas_src>
import jax
import jax.numpy as jnp
from jax.experimental import pallas as pl
from jax.experimental.pallas import tpu as pltpu


def _round_up(x, m):
    return ((x + m - 1) // m) * m


def _make_vq_kernel(tn, K, hw, needs_mask, l2_norm):
    def kernel(z_ref, cbn2_ref, cbt_ref, e2_ref, q_ref, idx_ref, cnt_ref, sse_ref):
        i = pl.program_id(1)                         # HW-tile index

        zt = z_ref[...].astype(jnp.float32)          # (C, tn)  lane-dense tile of z

        if l2_norm:
            # fused per-column L2 normalization (rsqrt lands on the idle EUP slot);
            # equals torch's x / max(||x||, 1e-12).
            ssq = jnp.sum(zt * zt, axis=0, keepdims=True)            # (1, tn)
            zn = zt * jax.lax.rsqrt(jnp.maximum(ssq, 1e-24))
        else:
            zn = zt

        cbn2 = cbn2_ref[...]                         # (K, C)  = -2 * codebook
        cbt = cbt_ref[...]                           # (C, K)
        e2 = e2_ref[...]                             # (K, 1)  precomputed ||e||^2

        # Reduced distance ||e||^2 - 2 e.z (||z||^2 dropped -- argmin-invariant);
        # the -2 factor is folded into cbn2, so no extra (K, tn) VPU multiply.
        dists = e2 + jnp.dot(cbn2, zn, preferred_element_type=jnp.float32)  # (K, tn)

        # argmin along K with first-occurrence tie-break (matches torch.argmin).
        min_d = jnp.min(dists, axis=0, keepdims=True)                # (1, tn)
        iota_k = jax.lax.broadcasted_iota(jnp.int32, (K, tn), 0)     # (K, tn)
        idx = jnp.min(jnp.where(dists == min_d, iota_k, K),
                      axis=0, keepdims=True).astype(jnp.int32)       # (1, tn)

        onehot = (iota_k == idx).astype(jnp.float32)                 # (K, tn)
        # Gather codebook rows via one-hot matmul; output stays lane-dense (C, tn).
        qt = jnp.dot(cbt, onehot, preferred_element_type=jnp.float32)

        q_ref[...] = qt.astype(q_ref.dtype)
        idx_ref[...] = idx

        # SSE against the *original* (unnormalized) z -- matches torch's
        # mse_loss(z, quantized_z) in both the plain and l2_norm paths.
        diff = zt - qt
        if needs_mask:
            col = i * tn + jax.lax.broadcasted_iota(jnp.int32, (1, tn), 1)
            valid = col < hw
            onehot_cnt = jnp.where(valid, onehot, 0.0)
            diff = jnp.where(valid, diff, 0.0)
        else:
            onehot_cnt = onehot

        # Per-tile partials (reduced in the wrapper) -> both grid axes "parallel".
        cnt_ref[...] = jnp.sum(onehot_cnt, axis=1, keepdims=True).reshape(1, 1, K, 1)
        sse_ref[...] = jnp.sum(diff * diff).reshape(1, 1, 1, 1)

    return kernel


def vq_pallas(z3, cbn2, cbt, e2, *, l2_norm=False, tn=None):
    """z3: (B, C, HW) NCHW-flattened input.
    cbn2: (K, C) = -2 * codebook; cbt: (C, K); e2: (K, 1) = ||e||^2.
    Returns (quantized (B, C, HW), indices (B, 1, HW), counts (K,), sse scalar)."""
    B, C, HW = z3.shape
    K = cbn2.shape[0]

    kp = max(_round_up(K, 8), 8)
    per_col = (6 * kp + 16 * max(C, 8) + 16) * 4   # bytes of (K,·)/(C,·) temps per column
    if tn is None:
        # Size the tile from the (K, tn) in-kernel temporaries; ~40 MiB budget keeps
        # the whole working set comfortably under v7x's 64 MiB VMEM (v5e/v6e: 128 MiB).
        budget = 40 * 1024 * 1024
        tn = (budget // per_col) // 128 * 128
        tn = max(128, min(8192, tn))
    tn = max(128, _round_up(int(tn), 128))
    tn = min(tn, _round_up(HW, 128))
    # Guarantee >= 2 grid steps so both v7x TensorCores get work.
    if B * ((HW + tn - 1) // tn) < 2 and HW > 128:
        tn = max(128, _round_up((HW + 1) // 2, 128))
    g = (HW + tn - 1) // tn
    needs_mask = (HW % tn) != 0

    kernel = _make_vq_kernel(tn, K, HW, needs_mask, l2_norm)

    out_shapes = (
        jax.ShapeDtypeStruct((B, C, HW), z3.dtype),     # quantized, NCHW layout
        jax.ShapeDtypeStruct((B, 1, HW), jnp.int32),    # indices, lane-dense
        jax.ShapeDtypeStruct((B, g, K, 1), jnp.float32),  # per-tile code counts
        jax.ShapeDtypeStruct((B, g, 1, 1), jnp.float32),  # per-tile sum of squared error
    )

    temp_bytes = per_col * tn
    vmem_limit = int(min(56 * 1024 * 1024, max(32 * 1024 * 1024, 2 * temp_bytes)))

    q3, idx, cnt, sse = pl.pallas_call(
        kernel,
        out_shape=out_shapes,
        grid_spec=pltpu.PrefetchScalarGridSpec(
            num_scalar_prefetch=0,
            grid=(B, g),
            in_specs=[
                pl.BlockSpec((pl.Squeezed(), C, tn), lambda b, i: (b, 0, i)),  # z tile
                pl.BlockSpec((K, C), lambda b, i: (0, 0)),                     # -2*codebook
                pl.BlockSpec((C, K), lambda b, i: (0, 0)),                     # codebook^T
                pl.BlockSpec((K, 1), lambda b, i: (0, 0)),                     # ||e||^2
            ],
            out_specs=[
                pl.BlockSpec((pl.Squeezed(), C, tn), lambda b, i: (b, 0, i)),
                pl.BlockSpec((pl.Squeezed(), 1, tn), lambda b, i: (b, 0, i)),
                pl.BlockSpec((1, 1, K, 1), lambda b, i: (b, i, 0, 0)),
                pl.BlockSpec((1, 1, 1, 1), lambda b, i: (b, i, 0, 0)),
            ],
        ),
        compiler_params=pltpu.CompilerParams(
            dimension_semantics=("parallel", "parallel"),
            vmem_limit_bytes=vmem_limit),
    )(z3, cbn2, cbt, e2)

    counts = jnp.sum(cnt, axis=(0, 1, 3))    # (K,)
    sse_total = jnp.sum(sse)                 # scalar
    return q3, idx, counts, sse_total


def vector_quantizer_forward(z, codebook, l2_norm=False, return_perplexity=True, tn=None):
    """Forward pass mirroring VectorQuantizer.forward (forward-value semantics)."""
    B, C, H, W = z.shape
    HW = H * W
    N = B * HW

    # (B,C,H,W) -> (B,C,HW) is a free reshape; the kernel grid runs directly over
    # (B, HW) so no wrapper transposes / pads.  Flattened index ordering (b, h*W+w)
    # matches torch's permute(0,2,3,1).reshape(-1, C) row ordering.
    z3 = z.reshape(B, C, HW)

    cb = codebook.astype(jnp.float32)
    if l2_norm:
        cb = cb / jnp.maximum(jnp.linalg.norm(cb, axis=1, keepdims=True), 1e-12)
    cbn2 = -2.0 * cb                                  # fold -2 into the MXU operand (one-time K x C op)
    cbt = cb.T                                        # (C, K) for the gather matmul
    e2 = jnp.sum(cb * cb, axis=1, keepdims=True)      # (K, 1) hoisted ||e||^2

    q3, idx, counts, sse = vq_pallas(z3, cbn2, cbt, e2, l2_norm=l2_norm, tn=tn)

    quantized_z = q3.reshape(B, C, H, W)
    indices = idx.reshape(N)

    # loss_vq / loss_commit have identical forward values: mse(z, quantized_z);
    # the kernel accumulates SSE against the original z (correct for l2_norm too).
    mse = sse / (N * C)
    loss_vq = mse
    loss_commit = mse

    perplexity = None
    if return_perplexity:
        probs = counts / N
        perplexity = jnp.exp(-jnp.sum(probs * jnp.log(jnp.clip(probs, 1e-10))))

    # Straight-through estimator: forward value is exactly quantized_z.
    # TODO(synk): gradient routing of z + (q - z).detach() needs a custom VJP.
    # TODO(synk): entropy_loss (use_entropy_reg) and EMA codebook update are not
    #             implemented (both default off in the reference module).
    # TODO(synk): for very large codebooks (K >= ~2048) add a K-streaming grid axis
    #             so (K, tn) temporaries don't force tn down to 128 on v7x.
    return dict(quantized_z=quantized_z,
                indices=indices,
                perplexity=perplexity,
                loss_vq=loss_vq,
                loss_commit=loss_commit,
                loss_entropy=None)


def _reference_forward(z, codebook):
    """Pure-JAX reference mirroring the torch module (l2_norm=False path)."""
    B, C, H, W = z.shape
    flat_z = jnp.transpose(z, (0, 2, 3, 1)).reshape(-1, C)
    dists = (jnp.sum(flat_z ** 2, axis=1, keepdims=True)
             + jnp.sum(codebook ** 2, axis=1)
             - 2.0 * flat_z @ codebook.T)
    indices = jnp.argmin(dists, axis=1)
    qz = jnp.transpose(codebook[indices].reshape(B, H, W, C), (0, 3, 1, 2))
    loss = jnp.mean((z - qz) ** 2)
    onehot = jax.nn.one_hot(indices, codebook.shape[0], dtype=jnp.float32)
    probs = jnp.mean(onehot, axis=0)
    perp = jnp.exp(-jnp.sum(probs * jnp.log(jnp.clip(probs, 1e-10))))
    return qz, indices, loss, perp


if __name__ == "__main__":
    key = jax.random.PRNGKey(0)
    k_z, k_cb = jax.random.split(key)

    B, C, H, W = 2, 4, 16, 16      # z: NCHW, codebook_dim = C = 4
    codebook_num = 64

    z = jax.random.normal(k_z, (B, C, H, W), dtype=jnp.float32)
    # deterministic init matching nn.init.uniform_(-1/K, 1/K)
    codebook = jax.random.uniform(
        k_cb, (codebook_num, C),
        minval=-1.0 / codebook_num, maxval=1.0 / codebook_num,
        dtype=jnp.float32)

    out = vector_quantizer_forward(z, codebook)
    jax.block_until_ready(out["quantized_z"])
    jax.block_until_ready(out["indices"])
    jax.block_until_ready(out["perplexity"])
    jax.block_until_ready(out["loss_vq"])
    jax.block_until_ready(out["loss_commit"])

    # Tolerance-based correctness check against the pure-JAX reference (the kernel
    # uses the argmin-invariant reduced distance, so compare values, not raw dists).
    qz_ref, idx_ref, loss_ref, perp_ref = _reference_forward(z, codebook)
    assert jnp.allclose(out["quantized_z"], qz_ref, atol=1e-5, rtol=1e-5)
    assert jnp.allclose(out["loss_vq"], loss_ref, atol=1e-6, rtol=1e-5)
    assert jnp.allclose(out["perplexity"], perp_ref, atol=1e-4, rtol=1e-5)

    print("KERNEL_OK")
</pallas_src>

<mosaic_0001>
module attributes {stable_mosaic.version = 11 : i64} {
  func.func @kernel(%arg0: i32, %arg1: i32, %arg2: memref<1x4x256xf32, #tpu.memory_space<vmem>>, %arg3: memref<64x4xf32, #tpu.memory_space<vmem>>, %arg4: memref<4x64xf32, #tpu.memory_space<vmem>>, %arg5: memref<64x1xf32, #tpu.memory_space<vmem>>, %arg6: memref<1x4x256xf32, #tpu.memory_space<vmem>>, %arg7: memref<1x1x256xi32, #tpu.memory_space<vmem>>, %arg8: memref<1x1x64x1xf32, #tpu.memory_space<vmem>>, %arg9: memref<1x1x1x1xf32, #tpu.memory_space<vmem>>) attributes {dimension_semantics = [#tpu.dimension_semantics<parallel>, #tpu.dimension_semantics<parallel>], iteration_bounds = array<i64: 2, 1>, scalar_prefetch = 0 : i64, scratch_operands = 0 : i64, tpu.core_type = #tpu.core_type<tc>, window_params = [{transform_indices = @transform_0, window_bounds = array<i64: 1, 4, 256>}, {pipeline_mode = #tpu.pipeline_mode<synchronous>, transform_indices = @transform_1, window_bounds = array<i64: 64, 4>}, {pipeline_mode = #tpu.pipeline_mode<synchronous>, transform_indices = @transform_2, window_bounds = array<i64: 4, 64>}, {pipeline_mode = #tpu.pipeline_mode<synchronous>, transform_indices = @transform_3, window_bounds = array<i64: 64, 1>}, {transform_indices = @transform_4, window_bounds = array<i64: 1, 4, 256>}, {transform_indices = @transform_5, window_bounds = array<i64: 1, 1, 256>}, {transform_indices = @transform_6, window_bounds = array<i64: 1, 1, 64, 1>}, {transform_indices = @transform_7, window_bounds = array<i64: 1, 1, 1, 1>}]} {
    %c0 = arith.constant 0 : index
    %c0_0 = arith.constant 0 : index
    %c0_1 = arith.constant 0 : index
    %0 = vector.load %arg2[%c0, %c0_0, %c0_1] : memref<1x4x256xf32, #tpu.memory_space<vmem>>, vector<1x4x256xf32>
    %1 = vector.shape_cast %0 : vector<1x4x256xf32> to vector<4x256xf32>
    %c0_2 = arith.constant 0 : index
    %c0_3 = arith.constant 0 : index
    %2 = vector.load %arg3[%c0_2, %c0_3] : memref<64x4xf32, #tpu.memory_space<vmem>>, vector<64x4xf32>
    %c0_4 = arith.constant 0 : index
    %c0_5 = arith.constant 0 : index
    %3 = vector.load %arg4[%c0_4, %c0_5] : memref<4x64xf32, #tpu.memory_space<vmem>>, vector<4x64xf32>
    %c0_6 = arith.constant 0 : index
    %c0_7 = arith.constant 0 : index
    %4 = vector.load %arg5[%c0_6, %c0_7] : memref<64x1xf32, #tpu.memory_space<vmem>>, vector<64x1xf32>
    %cst = arith.constant dense<0.000000e+00> : vector<64x256xf32>
    %5 = tpu.matmul %2, %1, %cst {dimension_numbers = #tpu.dot_dimension_numbers<[1], [0], [0], [1], [0, 0, 1, 1], [], []>} : vector<64x4xf32>, vector<4x256xf32>, vector<64x256xf32> -> vector<64x256xf32>
    %6 = vector.broadcast %4 : vector<64x1xf32> to vector<64x256xf32>
    %7 = arith.addf %6, %5 : vector<64x256xf32>
    %cst_8 = arith.constant dense<0x7F800000> : vector<256xf32>
    %8 = vector.multi_reduction <minimumf>, %7, %cst_8 [0] : vector<64x256xf32> to vector<256xf32>
    %9 = vector.shape_cast %8 : vector<256xf32> to vector<1x256xf32>
    %10 = tpu.iota {dimensions = array<i32: 0>} : vector<64x256xi32>
    %11 = vector.broadcast %9 : vector<1x256xf32> to vector<64x256xf32>
    %12 = arith.cmpf oeq, %7, %11 : vector<64x256xf32>
    %c64_i32 = arith.constant 64 : i32
    %13 = vector.broadcast %c64_i32 : i32 to vector<64x256xi32>
    %14 = arith.select %12, %10, %13 : vector<64x256xi1>, vector<64x256xi32>
    %cst_9 = arith.constant dense<2147483647> : vector<256xi32>
    %15 = vector.multi_reduction <minsi>, %14, %cst_9 [0] : vector<64x256xi32> to vector<256xi32>
    %16 = vector.shape_cast %15 : vector<256xi32> to vector<1x256xi32>
    %17 = vector.broadcast %16 : vector<1x256xi32> to vector<64x256xi32>
    %18 = arith.cmpi eq, %10, %17 : vector<64x256xi32>
    %19 = arith.extui %18 : vector<64x256xi1> to vector<64x256xi32>
    %20 = arith.sitofp %19 : vector<64x256xi32> to vector<64x256xf32>
    %cst_10 = arith.constant dense<0.000000e+00> : vector<4x256xf32>
    %21 = tpu.matmul %3, %20, %cst_10 {dimension_numbers = #tpu.dot_dimension_numbers<[1], [0], [0], [1], [0, 0, 1, 1], [], []>} : vector<4x64xf32>, vector<64x256xf32>, vector<4x256xf32> -> vector<4x256xf32>
    %c0_11 = arith.constant 0 : index
    %c0_12 = arith.constant 0 : index
    %c0_13 = arith.constant 0 : index
    %22 = vector.load %arg6[%c0_11, %c0_12, %c0_13] : memref<1x4x256xf32, #tpu.memory_space<vmem>>, vector<1x4x256xf32>
    %23 = vector.shape_cast %22 : vector<1x4x256xf32> to vector<4x256xf32>
    %24 = vector.shape_cast %21 : vector<4x256xf32> to vector<1x4x256xf32>
    tpu.vector_store %arg6[%c0_11, %c0_12, %c0_13], %24 {strides = array<i32>} : memref<1x4x256xf32, #tpu.memory_space<vmem>>, vector<1x4x256xf32>,
    %c0_14 = arith.constant 0 : index
    %c0_15 = arith.constant 0 : index
    %c0_16 = arith.constant 0 : index
    %25 = vector.load %arg7[%c0_14, %c0_15, %c0_16] : memref<1x1x256xi32, #tpu.memory_space<vmem>>, vector<1x1x256xi32>
    %26 = vector.shape_cast %25 : vector<1x1x256xi32> to vector<1x256xi32>
    %27 = vector.shape_cast %16 : vector<1x256xi32> to vector<1x1x256xi32>
    tpu.vector_store %arg7[%c0_14, %c0_15, %c0_16], %27 {strides = array<i32>} : memref<1x1x256xi32, #tpu.memory_space<vmem>>, vector<1x1x256xi32>,
    %28 = arith.subf %1, %21 : vector<4x256xf32>
    %cst_17 = arith.constant dense<0.000000e+00> : vector<64xf32>
    %29 = vector.multi_reduction <add>, %20, %cst_17 [1] : vector<64x256xf32> to vector<64xf32>
    %30 = vector.shape_cast %29 : vector<64xf32> to vector<64x1xf32>
    %31 = vector.shape_cast %30 : vector<64x1xf32> to vector<1x1x64x1xf32>
    %c0_18 = arith.constant 0 : index
    %c0_19 = arith.constant 0 : index
    %c0_20 = arith.constant 0 : index
    %c0_21 = arith.constant 0 : index
    %32 = vector.load %arg8[%c0_18, %c0_19, %c0_20, %c0_21] : memref<1x1x64x1xf32, #tpu.memory_space<vmem>>, vector<1x1x64x1xf32>
    tpu.vector_store %arg8[%c0_18, %c0_19, %c0_20, %c0_21], %31 {strides = array<i32>} : memref<1x1x64x1xf32, #tpu.memory_space<vmem>>, vector<1x1x64x1xf32>,
    %33 = arith.mulf %28, %28 : vector<4x256xf32>
    %34 = vector.shape_cast %33 : vector<4x256xf32> to vector<1x4x256xf32>
    %cst_22 = arith.constant dense<0.000000e+00> : vector<1xf32>
    %35 = vector.multi_reduction <add>, %34, %cst_22 [1, 2] : vector<1x4x256xf32> to vector<1xf32>
    %36 = vector.shape_cast %35 : vector<1xf32> to vector<1x1x1xf32>
    %37 = vector.extract %36[0, 0, 0] : f32 from vector<1x1x1xf32>
    %38 = vector.broadcast %37 : f32 to vector<1x1x1x1xf32>
    %c0_23 = arith.constant 0 : index
    %c0_24 = arith.constant 0 : index
    %c0_25 = arith.constant 0 : index
    %c0_26 = arith.constant 0 : index
    %39 = vector.load %arg9[%c0_23, %c0_24, %c0_25, %c0_26] : memref<1x1x1x1xf32, #tpu.memory_space<vmem>>, vector<1x1x1x1xf32>
    tpu.vector_store %arg9[%c0_23, %c0_24, %c0_25, %c0_26], %38 {strides = array<i32>} : memref<1x1x1x1xf32, #tpu.memory_space<vmem>>, vector<1x1x1x1xf32>,
    return
  }
  func.func @transform_0(%arg0: i32, %arg1: i32) -> (i32, i32, i32) {
    %c0_i32 = arith.constant 0 : i32
    %c0_i32_0 = arith.constant 0 : i32
    return %arg0, %c0_i32, %arg1 : i32, i32, i32
  }
  func.func @transform_1(%arg0: i32, %arg1: i32) -> (i32, i32) {
    %c0_i32 = arith.constant 0 : i32
    %c0_i32_0 = arith.constant 0 : i32
    %c0_i32_1 = arith.constant 0 : i32
    return %c0_i32, %c0_i32_0 : i32, i32
  }
  func.func @transform_2(%arg0: i32, %arg1: i32) -> (i32, i32) {
    %c0_i32 = arith.constant 0 : i32
    %c0_i32_0 = arith.constant 0 : i32
    %c0_i32_1 = arith.constant 0 : i32
    return %c0_i32, %c0_i32_0 : i32, i32
  }
  func.func @transform_3(%arg0: i32, %arg1: i32) -> (i32, i32) {
    %c0_i32 = arith.constant 0 : i32
    %c0_i32_0 = arith.constant 0 : i32
    %c0_i32_1 = arith.constant 0 : i32
    return %c0_i32, %c0_i32_0 : i32, i32
  }
  func.func @transform_4(%arg0: i32, %arg1: i32) -> (i32, i32, i32) {
    %c0_i32 = arith.constant 0 : i32
    %c0_i32_0 = arith.constant 0 : i32
    return %arg0, %c0_i32, %arg1 : i32, i32, i32
  }
  func.func @transform_5(%arg0: i32, %arg1: i32) -> (i32, i32, i32) {
    %c0_i32 = arith.constant 0 : i32
    %c0_i32_0 = arith.constant 0 : i32
    return %arg0, %c0_i32, %arg1 : i32, i32, i32
  }
  func.func @transform_6(%arg0: i32, %arg1: i32) -> (i32, i32, i32, i32) {
    %c0_i32 = arith.constant 0 : i32
    %c0_i32_0 = arith.constant 0 : i32
    %c0_i32_1 = arith.constant 0 : i32
    return %arg0, %arg1, %c0_i32, %c0_i32_0 : i32, i32, i32, i32
  }
  func.func @transform_7(%arg0: i32, %arg1: i32) -> (i32, i32, i32, i32) {
    %c0_i32 = arith.constant 0 : i32
    %c0_i32_0 = arith.constant 0 : i32
    %c0_i32_1 = arith.constant 0 : i32
    return %arg0, %arg1, %c0_i32, %c0_i32_0 : i32, i32, i32, i32
  }
}

</mosaic_0001>

<bundles_post_ra>
// kernel: tpu_custom_call.1
= control target key start
LH: loop header
LB: loop body
LE: loop exit
PB: predicated region body
PF: predicated region fallthrough
CT: control target
= control target key end

     0   :  { %s1887_s0 = inlined_call_operand.vmem [shape: f32[2,4,256], index: 0, kind: input, shape index: {}]   ;;  %s1888_s1 = inlined_call_operand.vmem [shape: f32[64,4], index: 1, kind: input, shape index: {}]   ;;  %s1889_s2 = inlined_call_operand.vmem [shape: f32[4,64], index: 2, kind: input, shape index: {}]   ;;  %s1890_s3 = inlined_call_operand.vmem [shape: f32[64,1], index: 3, kind: input, shape index: {}]   ;;  %s1891_s4 = inlined_call_operand.hbm [shape: f32[2,4,256], index: 4, kind: output, shape index: {0}]   ;;  %s1892_s5 = inlined_call_operand.hbm [shape: s32[2,1,256], index: 5, kind: output, shape index: {1}]   ;;  %s1893_s6 = inlined_call_operand.vmem [shape: f32[2,1,64,1], index: 6, kind: output, shape index: {2}]   ;;  %s1894_s7 = inlined_call_operand.vmem [shape: f32[2,1,1,1], index: 7, kind: output, shape index: {3}]  }
   0x1   :  { %1896 = sst [smem:[#allocation8_spill]] %s1887_s0 }
   0x2   :  { %1897 = sst [smem:[#allocation9_spill]] %s1888_s1 }
   0x3   :  { %1898 = sst [smem:[#allocation10_spill]] %s1889_s2 }
   0x4   :  { %1899 = sst [smem:[#allocation11_spill]] %s1890_s3 }
   0x5   :  { %13 = vsyncpa [#allocation3], 0 }
   0x6   :  { %15 = vsyncpa [#allocation3 + $0x1], 0 }
   0x7   :  { %16 = vsyncpa [#allocation5], 0 }
   0x8   :  { %18 = vsyncpa [#allocation5 + $0x1], 0  ;;  %s1419_s24 = smov 0   ;;  %s1421_s25 = smov 0  }
   0x9   :  { %s1423_s26 = smov 0   ;;  %s1425_s27 = smov 0  }
   0xa   :  { %s1427_s28 = smov 0   ;;  %s1429_s29 = smov 0  }
   0xb LB: > { %s1130_s30 = sadd.s32 4294967295, %s1371_s29   ;;  %s1131_s8 = sadd.s32 4294967294, %s1371_s29   ;;  %s1371_s29 = sphi %s1429_s29, %s24_s29   ;;  %s1367_s28 = sphi %s1427_s28, %s1912_s28   ;;  %s1363_s27 = sphi %s1425_s27, %s1911_s27   ;;  %s1359_s26 = sphi %s1423_s26, %s1910_s26   ;;  %s1355_s25 = sphi %s1421_s25, %s1909_s25   ;;  %s1351_s24 = sphi %s1419_s24, %s1908_s24  }
   0xc   : > { %s36_s9 = sadd.s32 1, %s1367_s28  ;;  %s136_s10 = sadd.s32 1, %s1359_s26 }
   0xd   : > { %p38_p0 = scmp.ge.s32.totalorder %s36_s9, 2  ;;  %p146_p1 = scmp.ne.s32.totalorder %s1359_s26, %s1355_s25 }
   0xe   : > { %p147_p2 = scmp.eq.s32.totalorder %s1130_s30, 1  ;;  %p152_p3 = scmp.ne.s32.totalorder %s1355_s25, %s1351_s24 }
   0xf   : > { %s1914_s9 = smov (%p38_p0, %s36_s9), 0  ;;  %p153_p5 = scmp.eq.s32.totalorder %s1131_s8, 1 }
  0x10   : > { %p1459_p4 = por %p147_p2, %p146_p1  ;;  %s131_s12 = ssub.s32 %s1367_s28, %s1914_s9 }
  0x11   : > { %p1134_p6 = scmp.ge.s32.totalorder %s1371_s29, 1  ;;  %p134_p7 = scmp.eq.s32.totalorder %s131_s12, 0 }
  0x12   : > { %p1466_p8 = por %p153_p5, %p152_p3  ;;  %p277_p9 = scmp.lt.s32.totalorder %s1371_s29, 3 }
  0x13   : > { %s1472_s14 = scalar_select %p134_p7, %s1359_s26, %s136_s10  }
  0x14   : > { %p278_p10 = pnand %p1134_p6, %p277_p9 }
  0x15   : > { %p334_p11 = scmp.lt.s32.totalorder (!%p278_p10), %s1363_s27, 1  ;;  %s1902_s3 = sld [smem:[#allocation11_spill]] (!%p278_p10) }
  0x16   : > { %281 = sbr.rel (%p278_p10) target bundleno = 733 (0x2dd), region = 36  ;;  %s1903_s0 = sld [smem:[#allocation8_spill]] (!%p278_p10) }
  0x17   : > { %s1904_s1 = sld [smem:[#allocation9_spill]] (!%p278_p10)  ;;  %s1713_s16 = sand.u32 (!%p278_p10), 1, %s1355_s25  }
  0x18   : > { %s1136_s17 = sshll.u32 (!%p278_p10), %s1713_s16, 1  ;;  %s1905_s2 = sld [smem:[#allocation10_spill]] (!%p278_p10) }
  0x19   : > { %s1778_s18 = scalar_lea.vmem (!%p278_p10), [#allocation4], %s1136_s17  ;;  %s1135_s8 = sshll.u32 (!%p278_p10), %s1713_s16, 3 }
  0x1a   : > { %s306_s10 = scalar_lea.vmem (!%p278_p10), [#allocation2], %s1135_s8  ;;  %s1194_s12 = sshll.u32 (!%p278_p10), %s1363_s27, 7 }
  0x1b   : > { %v1373_v0 = vmov 0.0   ;;  %s1478_s15 = scalar_select %p334_p11, %s1363_s27, 1  ;;  %v1374_v1 = vmov 0   ;;  %v370_v2 = vld [vmem:[%s1902_s3] sm:$0xff]  ;;  %v372_v3 = vld [vmem:[%s1902_s3 + $0x10] sm:$0xff]  ;;  %v371_v4 = vld [vmem:[%s1902_s3 + $0x8] sm:$0xff] }
  0x1c   : > { %474 = vmatprep.mubr.f32.mxu0 %v1373_v0  ;;  %808 = vmatprep.mubr.f32.mxu1 %v1373_v0  ;;  %v373_v5 = vld [vmem:[%s1902_s3 + $0x18] sm:$0xff]  ;;  %vm1895_vm0 = vcmask 1043456   ;;  %vm380_vm1 = vcmask 31744   ;;  %v375_v9 = vld [vmem:[%s1902_s3 + $0x28] sm:$0xff]  ;;  %v374_v10 = vld [vmem:[%s1902_s3 + $0x20] sm:$0xff]  ;;  %s894_s22 = scalar_lea.sflag [#allocation3], %s1713_s16 }
  0x1d   : > { %1262 = vset.pattern.permute.xlu0 %v1374_v1  ;;  %1263 = vset.pattern.permute.xlu1 %v1374_v1  ;;  %s1192_s20 = sshll.u32 %s1478_s15, 3  ;;  %v361_v8 = vld [vmem:[%s1904_s1] sm:$0xff]  ;;  %v362_v11 = vld [vmem:[%s1904_s1 + $0x8] sm:$0xff]  ;;  %v377_v12 = vld [vmem:[%s1902_s3 + $0x38] sm:$0xff]  ;;  %s1193_s21 = sshll.u32 %s1478_s15, 6 }
  0x1e   : > { %525 = vperm.xlu0 %1262, %v370_v2   ;;  %535 = vperm.xlu1 %1263, %v372_v3   ;;  %s341_s23 = scalar_lea.vmem %s1903_s0, %s1192_s20  ;;  %v376_v13 = vld [vmem:[%s1902_s3 + $0x30] sm:$0xff]  ;;  %v364_v15 = vld [vmem:[%s1904_s1 + $0x18] sm:$0xff]  ;;  %v365_v16 = vld [vmem:[%s1904_s1 + $0x20] sm:$0xff]  ;;  %s1804_s30 = scalar_lea.vmem %s1893_s6, %s1193_s21 }
  0x1f   : > { %v1496_v6 = vld [vmem:[%s341_s23] sm:$0xff]  ;;  %v363_v14 = vld [vmem:[%s1904_s1 + $0x10] sm:$0xff]  ;;  %v366_v17 = vld [vmem:[%s1904_s1 + $0x28] sm:$0xff]  ;;  %s928_s20 = scalar_lea.hbm %s1891_s4, %s1194_s12  ;;  %s930_s21 = sshll.u32 %s306_s10, 4  ;;  %s931_s21 = int_to_ptr.vmem [resolvable:$true] %s930_s21 }
  0x20   : > { %v379_v7 = vcombine.high %v1496_v6, %v1496_v6  ;;  %v367_v18 = vld [vmem:[%s1904_s1 + $0x30] sm:$0xff]  ;;  %v368_v19 = vld [vmem:[%s1904_s1 + $0x38] sm:$0xff]  ;;  %s1265_s23 = scalar_lea.vmem %s931_s21, 128  ;;  %s1377_s8 = smov [#allocation2]  }
  0x21   : > { %p1266_p12 = scmp.ne.s32.totalorder %s931_s21, %s1265_s23  ;;  %s1269_s0 = sshll.u32 %s1377_s8, 4  ;;  %s1270_s0 = int_to_ptr.vmem [resolvable:$false] %s1269_s0 }
  0x22   : > { %530 = vperm.xlu0 %1262, %v371_v4   ;;  %540 = vperm.xlu1 %1263, %v373_v5   ;;  %s1271_s1 = scalar_lea.vmem %s1270_s0, 256  ;;  %p1272_p1 = scmp.lt.s32.totalorder %s931_s21, %s1270_s0 }
  0x23   : > { %1141 = vmatprep.subr.msk.mxu0 %vm1895_vm0, %v379_v7  ;;  %p1267_p13 = pnand %p1266_p12, %p1459_p4  ;;  %p1273_p2 = scmp.lt.s32.totalorder %s1271_s1, %s1265_s23 }
  0x24   : > { %1142 = vmatpush1.msk.msra.mxu0 %vm1895_vm0, %v1496_v6 }
  0x25   : > { %1143 = vmatmul.mubr.msk.f32.vlgmr.msra.gmra.mxu0 %vm380_vm1, %v361_v8  ;;  %p1268_p0 = pneg %p1267_p13  ;;  %p1274_p3 = por %p1273_p2, %p1272_p1 }
  0x26   : > { %480 = vmatprep.mubr.f32.mxu0 %v1373_v0  ;;  %550 = vperm.xlu1 %1263, %v375_v9  }
  0x27   : > { %545 = vperm.xlu0 %1262, %v374_v10   ;;  %p1275_p5 = pnand %p1274_p3, %p1268_p0 }
  0x29   : > { %1144 = vmatmul.mubr.msk.f32.gmra.mxu0 %vm380_vm1, %v362_v11 }
  0x2a   : > { %486 = vmatprep.mubr.f32.mxu0 %v1373_v0  ;;  %560 = vperm.xlu1 %1263, %v377_v12  }
  0x2b   : > { %555 = vperm.xlu0 %1262, %v376_v13  }
  0x2d   : > { %1145 = vmatmul.mubr.msk.f32.gmra.mxu0 %vm380_vm1, %v363_v14  ;;  %v605_v14 = vlaneseq }
  0x2e   : > { %492 = vmatprep.mubr.f32.mxu0 %v1373_v0 }
  0x31   : > { %1146 = vmatmul.mubr.msk.f32.gmra.mxu0 %vm380_vm1, %v364_v15 }
  0x32   : > { %498 = vmatprep.mubr.f32.mxu0 %v1373_v0 }
  0x35   : > { %1147 = vmatmul.mubr.msk.f32.gmra.mxu0 %vm380_vm1, %v365_v16 }
  0x36   : > { %504 = vmatprep.mubr.f32.mxu0 %v1373_v0 }
  0x39   : > { %1148 = vmatmul.mubr.msk.f32.gmra.mxu0 %vm380_vm1, %v366_v17 }
  0x3a   : > { %510 = vmatprep.mubr.f32.mxu0 %v1373_v0 }
  0x3d   : > { %1149 = vmatmul.mubr.msk.f32.gmra.mxu0 %vm380_vm1, %v367_v18 }
  0x3e   : > { %516 = vmatprep.mubr.f32.mxu0 %v1373_v0 }
  0x41   : > { %1150 = vmatmul.mubr.msk.f32.gmra.mxu0 %vm380_vm1, %v368_v19  ;;  %v1588_v19 = vshrl.u32 %v605_v14, 7 }
  0x99   : > { %v526_v25 = vpop.permute.xlu0 %525  ;;  %v536_v26 = vpop.permute.xlu1 %535 }
  0x9d   : > { %v531_v30 = vpop.permute.xlu0 %530  ;;  %v541_v31 = vpop.permute.xlu1 %540 }
  0xa1   : > { %v551_v36 = vpop.permute.xlu1 %550 }
  0xa2   : > { %v546_v34 = vpop.permute.xlu0 %545 }
  0xa5   : > { %v561_v58 = vpop.permute.xlu1 %560 }
  0xa6   : > { %v556_v49 = vpop.permute.xlu0 %555 }
  0xe5   : > { %v476_v20 = vpop.f32.mrf.mxu0 }
  0xe6   : > { %v563_v43 = vadd.f32 %v526_v25, %v476_v20 }
  0xe7   : > { %v478_v21 = vpop.f32.mrf.mxu0 }
  0xe8   : > { %v1564_v47 = vadd.f32 %v526_v25, %v478_v21  ;;  %v1594_v25 = vadd.s32 16, %v1588_v19 }
  0xe9   : > { %v482_v22 = vpop.f32.mrf.mxu0 }
  0xea   : > { %v565_v44 = vadd.f32 %v531_v30, %v482_v22 }
  0xeb   : > { %v484_v23 = vpop.f32.mrf.mxu0 }
  0xec   : > { %v1566_v48 = vadd.f32 %v531_v30, %v484_v23 }
  0xed   : > { %v488_v24 = vpop.f32.mrf.mxu0 }
  0xee   : > { %v1554_v38 = vadd.f32 %v536_v26, %v488_v24  ;;  %v1591_v24 = vadd.s32 8, %v1588_v19 }
  0xef   : > { %v490_v27 = vpop.f32.mrf.mxu0 }
  0xf0   : > { %v1558_v40 = vadd.f32 %v536_v26, %v490_v27  ;;  %v579_v52 = vmin.f32 %v563_v43, %v1554_v38  ;;  %v1597_v26 = vadd.s32 24, %v1588_v19  ;;  %v1600_v27 = vadd.s32 32, %v1588_v19 }
  0xf1   : > { %v494_v28 = vpop.f32.mrf.mxu0 }
  0xf2   : > { %v1556_v39 = vadd.f32 %v541_v31, %v494_v28  ;;  %v592_v56 = vmin.f32 %v1564_v47, %v1558_v40  ;;  %v1603_v28 = vadd.s32 40, %v1588_v19 }
  0xf3   : > { %v496_v29 = vpop.f32.mrf.mxu0 }
  0xf4   : > { %v1560_v41 = vadd.f32 %v541_v31, %v496_v29  ;;  %v580_v53 = vmin.f32 %v565_v44, %v1556_v39  ;;  %v1606_v29 = vadd.s32 48, %v1588_v19  ;;  %v1611_v31 = vadd.s32 56, %v1588_v19 }
  0xf5   : > { %v500_v32 = vpop.f32.mrf.mxu0 }
  0xf6   : > { %v571_v45 = vadd.f32 %v546_v34, %v500_v32  ;;  %v593_v57 = vmin.f32 %v1566_v48, %v1560_v41 }
  0xf7   : > { %v502_v33 = vpop.f32.mrf.mxu0 }
  0xf8   : > { %v1568_v50 = vadd.f32 %v546_v34, %v502_v33  ;;  %v581_v60 = vmin.f32 %v579_v52, %v571_v45 }
  0xf9   : > { %v506_v35 = vpop.f32.mrf.mxu0 }
  0xfa   : > { %v1562_v46 = vadd.f32 %v551_v36, %v506_v35  ;;  %v594_v1 = vmin.f32 %v592_v56, %v1568_v50 }
  0xfb   : > { %v508_v37 = vpop.f32.mrf.mxu0 }
  0xfc   : > { %v1572_v54 = vadd.f32 %v551_v36, %v508_v37  ;;  %v582_v61 = vmin.f32 %v580_v53, %v1562_v46 }
  0xfd   : > { %v512_v42 = vpop.f32.mrf.mxu0 }
  0xfe   : > { %v575_v55 = vadd.f32 %v556_v49, %v512_v42  ;;  %v595_v3 = vmin.f32 %v593_v57, %v1572_v54 }
  0xff   : > { %v514_v51 = vpop.f32.mrf.mxu0 }
 0x100   : > { %v1579_v62 = vadd.f32 %v556_v49, %v514_v51  ;;  %v583_v4 = vmin.f32 %v581_v60, %v575_v55 }
 0x101   : > { %v518_v59 = vpop.f32.mrf.mxu0 }
 0x102   : > { %v577_v63 = vadd.f32 %v561_v58, %v518_v59  ;;  %v596_v8 = vmin.f32 %v594_v1, %v1579_v62 }
 0x103   : > { %v520_v2 = vpop.f32.mrf.mxu0 }
 0x104   : > { %v584_v5 = vmin.f32 %v582_v61, %v577_v63  ;;  %v1583_v7 = vadd.f32 %v561_v58, %v520_v2 }
 0x106   : > { %v585_v9 = vmin.f32 %v583_v4, %v584_v5  ;;  %v597_v10 = vmin.f32 %v595_v3, %v1583_v7 }
 0x108   : > { %v586_v11 = vrot.slane %v585_v9, 4  ;;  %v598_v12 = vmin.f32 %v596_v8, %v597_v10 }
 0x10a   : > { %v587_v13 = vmin.f32 %v585_v9, %v586_v11  ;;  %v599_v15 = vrot.slane %v598_v12, 4 }
 0x10c   : > { %v588_v16 = vrot.slane %v587_v13, 2  ;;  %v600_v17 = vmin.f32 %v598_v12, %v599_v15 }
 0x10e   : > { %v589_v18 = vmin.f32 %v587_v13, %v588_v16  ;;  %v601_v20 = vrot.slane %v600_v17, 2 }
 0x110   : > { %v590_v21 = vrot.slane %v589_v18, 1  ;;  %v602_v22 = vmin.f32 %v600_v17, %v601_v20 }
 0x112   : > { %v591_v23 = vmin.f32 %v589_v18, %v590_v21  ;;  %v603_v30 = vrot.slane %v602_v22, 1 }
 0x114   : > { %vm614_vm2 = vcmp.eq.f32.partialorder %v563_v43, %v591_v23  ;;  %vm616_vm3 = vcmp.eq.f32.partialorder %v565_v44, %v591_v23  ;;  %vm618_vm4 = vcmp.eq.f32.partialorder %v1554_v38, %v591_v23  ;;  %vm620_vm5 = vcmp.eq.f32.partialorder %v1556_v39, %v591_v23 }
 0x115   : > { %vm622_vm6 = vcmp.eq.f32.partialorder %v571_v45, %v591_v23  ;;  %vm624_vm7 = vcmp.eq.f32.partialorder %v1562_v46, %v591_v23  ;;  %vm626_vm8 = vcmp.eq.f32.partialorder %v575_v55, %v591_v23  ;;  %v630_v32 = vsel %vm614_vm2, %v1588_v19, 64 }
 0x116   : > { %v632_v33 = vsel %vm616_vm3, %v1591_v24, 64  ;;  %v634_v34 = vsel %vm618_vm4, %v1594_v25, 64  ;;  %v636_v35 = vsel %vm620_vm5, %v1597_v26, 64  ;;  %vm628_vm9 = vcmp.eq.f32.partialorder %v577_v63, %v591_v23 }
 0x117   : > { %v638_v36 = vsel %vm622_vm6, %v1600_v27, 64  ;;  %vm646_vm10 = vcmp.lt.s32.totalorder %v630_v32, %v634_v34  ;;  %vm648_vm11 = vcmp.lt.s32.totalorder %v632_v33, %v636_v35  ;;  %v604_v37 = vmin.f32 %v602_v22, %v603_v30 }
 0x118   : > { %v640_v38 = vsel %vm624_vm7, %v1603_v28, 64  ;;  %v642_v39 = vsel %vm626_vm8, %v1606_v29, 64  ;;  %v647_v42 = vsel %vm646_vm10, %v630_v32, %v634_v34  ;;  %v649_v43 = vsel %vm648_vm11, %v632_v33, %v636_v35 }
 0x119   : > { %v644_v44 = vsel %vm628_vm9, %v1611_v31, 64  ;;  %vm650_vm12 = vcmp.lt.s32.totalorder %v647_v42, %v638_v36  ;;  %vm652_vm13 = vcmp.lt.s32.totalorder %v649_v43, %v640_v38  ;;  %vm615_vm14 = vcmp.eq.f32.partialorder %v1564_v47, %v604_v37 }
 0x11a   : > { %v651_v45 = vsel %vm650_vm12, %v647_v42, %v638_v36  ;;  %v653_v46 = vsel %vm652_vm13, %v649_v43, %v640_v38  ;;  %vm617_vm15 = vcmp.eq.f32.partialorder %v1566_v48, %v604_v37  ;;  %vm619_vm1 = vcmp.eq.f32.partialorder %v1558_v40, %v604_v37 }
 0x11b   : > { %vm654_vm2 = vcmp.lt.s32.totalorder %v651_v45, %v642_v39  ;;  %vm656_vm3 = vcmp.lt.s32.totalorder %v653_v46, %v644_v44  ;;  %vm621_vm4 = vcmp.eq.f32.partialorder %v1560_v41, %v604_v37  ;;  %vm623_vm5 = vcmp.eq.f32.partialorder %v1568_v50, %v604_v37 }
 0x11c   : > { %v655_v49 = vsel %vm654_vm2, %v651_v45, %v642_v39  ;;  %v657_v51 = vsel %vm656_vm3, %v653_v46, %v644_v44  ;;  %v631_v52 = vsel %vm615_vm14, %v1588_v19, 64  ;;  %v633_v53 = vsel %vm617_vm15, %v1591_v24, 64 }
 0x11d   : > { %vm658_vm6 = vcmp.lt.s32.totalorder %v655_v49, %v657_v51  ;;  %v635_v47 = vsel %vm619_vm1, %v1594_v25, 64  ;;  %vm625_vm7 = vcmp.eq.f32.partialorder %v1572_v54, %v604_v37  ;;  %v637_v40 = vsel %vm621_vm4, %v1597_v26, 64 }
 0x11e   : > { %v659_v55 = vsel %vm658_vm6, %v655_v49, %v657_v51  ;;  %vm627_vm8 = vcmp.eq.f32.partialorder %v1579_v62, %v604_v37  ;;  %vm669_vm9 = vcmp.lt.s32.totalorder %v631_v52, %v635_v47  ;;  %vm629_vm10 = vcmp.eq.f32.partialorder %v1583_v7, %v604_v37 }
 0x11f   : > { %v660_v48 = vrot.slane %v659_v55, 4  ;;  %v639_v41 = vsel %vm623_vm5, %v1600_v27, 64  ;;  %v670_v50 = vsel %vm669_vm9, %v631_v52, %v635_v47  ;;  %vm671_vm11 = vcmp.lt.s32.totalorder %v633_v53, %v637_v40 }
 0x120   : > { %v641_v56 = vsel %vm625_vm7, %v1603_v28, 64  ;;  %v672_v57 = vsel %vm671_vm11, %v633_v53, %v637_v40  ;;  %vm673_vm13 = vcmp.lt.s32.totalorder %v670_v50, %v639_v41  ;;  %v643_v54 = vsel %vm627_vm8, %v1606_v29, 64 }
 0x121   : > { %vm661_vm12 = vcmp.lt.s32.totalorder %v659_v55, %v660_v48  ;;  %v674_v59 = vsel %vm673_vm13, %v670_v50, %v639_v41  ;;  %vm675_vm14 = vcmp.lt.s32.totalorder %v672_v57, %v641_v56  ;;  %v645_v61 = vsel %vm629_vm10, %v1611_v31, 64 }
 0x122   : > { %v662_v58 = vsel %vm661_vm12, %v659_v55, %v660_v48  ;;  %v676_v62 = vsel %vm675_vm14, %v672_v57, %v641_v56  ;;  %vm677_vm15 = vcmp.lt.s32.totalorder %v674_v59, %v643_v54  ;;  %v1375_v7 = vmov 1966171168  }
 0x123   : > { %v663_v60 = vrot.slane %v662_v58, 2  ;;  %v678_v63 = vsel %vm677_vm15, %v674_v59, %v643_v54  ;;  %vm679_vm1 = vcmp.lt.s32.totalorder %v676_v62, %v645_v61  ;;  %v822_v8 = vunpack.c.l.s4 %v1375_v7 }
 0x124   : > { %v680_v1 = vsel %vm679_vm1, %v676_v62, %v645_v61  ;;  %v1376_v22 = vmov 1.0  }
 0x125   : > { %vm664_vm2 = vcmp.lt.s32.totalorder %v662_v58, %v663_v60  ;;  %vm681_vm3 = vcmp.lt.s32.totalorder %v678_v63, %v680_v1  ;;  %v823_v12 = vunpack.c.0.s8 %v822_v8 }
 0x126   : > { %v665_v2 = vsel %vm664_vm2, %v662_v58, %v663_v60  ;;  %v682_v4 = vsel %vm681_vm3, %v678_v63, %v680_v1 }
 0x127   : > { %v666_v3 = vrot.slane %v665_v2, 1  ;;  %v683_v5 = vrot.slane %v682_v4, 4  ;;  %v826_v16 = vsub.s32 %v823_v12, %v1588_v19 }
 0x129   : > { %vm667_vm4 = vcmp.lt.s32.totalorder %v665_v2, %v666_v3  ;;  %vm684_vm5 = vcmp.lt.s32.totalorder %v682_v4, %v683_v5 }
 0x12a   : > { %v685_v9 = vsel %vm684_vm5, %v682_v4, %v683_v5  ;;  %v1638_v10 = vsel %vm667_vm4, %v665_v2, %v666_v3 }
 0x12b   : > { %v686_v11 = vrot.slane %v685_v9, 2  ;;  %vm692_vm7 = vcmp.eq.s32.totalorder %v1588_v19, %v1638_v10  ;;  %vm698_vm8 = vcmp.eq.s32.totalorder %v1597_v26, %v1638_v10  ;;  %vm694_vm9 = vcmp.eq.s32.totalorder %v1591_v24, %v1638_v10 }
 0x12c   : > { %vm706_vm11 = vcmp.eq.s32.totalorder %v1611_v31, %v1638_v10  ;;  %vm704_vm12 = vcmp.eq.s32.totalorder %v1606_v29, %v1638_v10  ;;  %v1151_v17 = vsel %vm692_vm7, 1.0, %v1373_v0  ;;  %vm702_vm13 = vcmp.eq.s32.totalorder %v1603_v28, %v1638_v10 }
 0x12d   : > { %vm687_vm6 = vcmp.lt.s32.totalorder %v685_v9, %v686_v11  ;;  %vm700_vm14 = vcmp.eq.s32.totalorder %v1600_v27, %v1638_v10  ;;  %vm696_vm15 = vcmp.eq.s32.totalorder %v1594_v25, %v1638_v10  ;;  %v1157_v20 = vsel %vm698_vm8, 1.0, %v1373_v0 }
 0x12e   : > { %v688_v13 = vsel %vm687_vm6, %v685_v9, %v686_v11  ;;  %v1153_v21 = vsel %vm694_vm9, 1.0, %v1373_v0  ;;  %v1155_v32 = vsel %vm696_vm15, 1.0, %v1373_v0  ;;  %v1159_v33 = vsel %vm700_vm14, 1.0, %v1373_v0 }
 0x12f   : > { %v689_v15 = vrot.slane %v688_v13, 1  ;;  %v1163_v35 = vsel %vm704_vm12, 1.0, %v1373_v0  ;;  %v1161_v52 = vsel %vm702_vm13, 1.0, %v1373_v0 }
 0x131   : > { %vm690_vm10 = vcmp.lt.s32.totalorder %v688_v13, %v689_v15 }
 0x132   : > { %v1655_v18 = vsel %vm690_vm10, %v688_v13, %v689_v15 }
 0x133   : > { %vm707_vm1 = vcmp.eq.s32.totalorder %v1611_v31, %v1655_v18  ;;  %vm693_vm2 = vcmp.eq.s32.totalorder %v1588_v19, %v1655_v18  ;;  %vm705_vm3 = vcmp.eq.s32.totalorder %v1606_v29, %v1655_v18  ;;  %vm701_vm4 = vcmp.eq.s32.totalorder %v1600_v27, %v1655_v18 }
 0x134   : > { %1167 = vmatprep.subr.msk.mxu1 %vm707_vm1, %v1376_v22  ;;  %v1152_v23 = vsel %vm693_vm2, 1.0, %v1373_v0  ;;  %vm699_vm5 = vcmp.eq.s32.totalorder %v1597_v26, %v1655_v18  ;;  %vm697_vm6 = vcmp.eq.s32.totalorder %v1594_v25, %v1655_v18  ;;  %vm703_vm10 = vcmp.eq.s32.totalorder %v1603_v28, %v1655_v18  ;;  %v369_v26 = vld [vmem:[%s1905_s2] sm:$0xf] }
 0x135   : > { %1168 = vmatpush1.msk.msra.mxu1 %vm706_vm11, %v1376_v22  ;;  %v841_v30 = vadd.f32 %v1152_v23, %v1151_v17  ;;  %v1158_v34 = vsel %vm699_vm5, 1.0, %v1373_v0  ;;  %vm695_vm0 = vcmp.eq.s32.totalorder %v1591_v24, %v1655_v18  ;;  %v1156_v37 = vsel %vm697_vm6, 1.0, %v1373_v0 }
 0x136   : > { %1169 = vmatprep.subr.msk.mxu1 %vm705_vm3, %v1376_v22  ;;  %v1154_v36 = vsel %vm695_vm0, 1.0, %v1373_v0  ;;  %v1160_v38 = vsel %vm701_vm4, 1.0, %v1373_v0  ;;  %v1164_v39 = vsel %vm705_vm3, 1.0, %v1373_v0  ;;  %v847_v43 = vadd.f32 %v1156_v37, %v1155_v32 }
 0x137   : > { %1170 = vmatpush1.msk.msra.mxu1 %vm704_vm12, %v1376_v22  ;;  %842 = vadd.xlane.f32.xlu1 %v841_v30  ;;  %v844_v42 = vadd.f32 %v1154_v36, %v1153_v21  ;;  %v853_v44 = vadd.f32 %v1160_v38, %v1159_v33  ;;  %v859_v45 = vadd.f32 %v1164_v39, %v1163_v35  ;;  %v1162_v29 = vsel %vm703_vm10, 1.0, %v1373_v0 }
 0x138   : > { %1171 = vmatprep.subr.msk.mxu1 %vm703_vm10, %v1376_v22  ;;  %v850_v46 = vadd.f32 %v1158_v34, %v1157_v20  ;;  %v820_v49 = vcombine.low %v1638_v10, %v1655_v18  ;;  %vm837_vm12 = vcmp.lt.s32.totalorder %v605_v14, 256  ;;  %v856_v53 = vadd.f32 %v1162_v29, %v1161_v52 }
 0x139   : > { %1172 = vmatpush1.msk.msra.mxu1 %vm702_vm13, %v1376_v22  ;;  %v1166_v47 = vsel %vm707_vm1, 1.0, %v1373_v0  ;;  %v1165_v14 = vsel %vm706_vm11, 1.0, %v1373_v0 }
 0x13a   : > { %1173 = vmatprep.subr.msk.mxu1 %vm701_vm4, %v1376_v22  ;;  %v827_v51 = vrot.slane %v820_v49, %v826_v16  ;;  %v862_v25 = vadd.f32 %v1166_v47, %v1165_v14 }
 0x13b   : > { %1174 = vmatpush1.msk.msra.mxu1 %vm700_vm14, %v1376_v22  ;;  %851 = vadd.xlane.f32.xlu1 %v850_v46 }
 0x13c   : > { %1175 = vmatprep.subr.msk.mxu1 %vm699_vm5, %v1376_v22  ;;  %v834_v27 = vrot.slane %v827_v51, %v826_v16 }
 0x13d   : > { %1176 = vmatpush1.msk.msra.mxu1 %vm698_vm8, %v1376_v22  ;;  %vm740_vm8 = vcmask 523264  }
 0x13e   : > { %1177 = vmatprep.subr.msk.mxu1 %vm697_vm6, %v1376_v22  ;;  %839 = vst.msk [vmem:[%s1778_s18] sm:$0x3] %vm837_vm12, %v834_v27 }
 0x13f   : > { %1178 = vmatpush1.msk.msra.mxu1 %vm696_vm15, %v1376_v22  ;;  %857 = vadd.xlane.f32.xlu1 %v856_v53 }
 0x140   : > { %1179 = vmatprep.subr.msk.mxu1 %vm695_vm0, %v1376_v22  ;;  %vm865_vm0 = vcmask 7168  }
 0x141   : > { %1180 = vmatpush1.msk.msra.mxu1 %vm694_vm9, %v1376_v22 }
 0x142   : > { %1181 = vmatprep.subr.msk.mxu1 %vm693_vm2, %v1376_v22 }
 0x143   : > { %1182 = vmatpush1.msk.msra.mxu1 %vm692_vm7, %v1376_v22  ;;  %863 = vadd.xlane.f32.xlu1 %v862_v25  ;;  %vm1906_vm7 = vcmask 1043456  }
 0x144   : > { %1183 = vmatmul.mubr.msk.f32.vlgmr.msra.gmra.mxu1 %vm740_vm8, %v369_v26  ;;  %vm1907_vm9 = vmmov %vm1906_vm7 }
 0x1c0   : > { %v843_v0 = vpop.xlane.xlu1 %842 }
 0x1c1   : > { %866 = vst.msk [vmem:[%s1804_s30] sm:$0xff] %vm865_vm0, %v843_v0 }
 0x1c4   : > { %v852_v24 = vpop.xlane.xlu1 %851 }
 0x1c5   : > { %869 = vst.msk [vmem:[%s1804_s30 + $0x18] sm:$0xff] %vm865_vm0, %v852_v24 }
 0x1c8   : > { %v858_v19 = vpop.xlane.xlu1 %857 }
 0x1c9   : > { %871 = vst.msk [vmem:[%s1804_s30 + $0x28] sm:$0xff] %vm865_vm0, %v858_v19 }
 0x1cc   : > { %v864_v28 = vpop.xlane.xlu1 %863 }
 0x1cd   : > { %873 = vst.msk [vmem:[%s1804_s30 + $0x38] sm:$0xff] %vm865_vm0, %v864_v28 }
 0x204   : > { %v810_v31 = vpop.f32.mrf.mxu1 }
 0x206   : > { %v812_v55 = vpop.f32.mrf.mxu1 }
 0x207   : > { %v817_v40 = vcombine.low %v810_v31, %v812_v55 }
 0x209   : > { %819 = vst [vmem:[%s306_s10] sm:$0xff] %v817_v40  ;;  %v840_v48 = vsub.f32 %v1496_v6, %v817_v40 }
 0x20b   : > { %v874_v41 = vmul.f32 %v840_v48, %v840_v48 }
 0x20d   : > { %v876_v50 = vcombine.high %v874_v41, %v874_v41  ;;  %v878_v56 = vsel %vm1906_vm7, %v874_v41, 0.0 }
 0x20f   : > { %v879_v57 = vsel %vm1907_vm9, %v876_v50, 0.0 }
 0x210   : > { %v880_v58 = vadd.f32 %v879_v57, %v878_v56 }
 0x212   : > { %881 = vadd.xlane.f32.xlu0 %v880_v58 }
 0x216   : > { %845 = vadd.xlane.f32.xlu0 %v844_v42 }
 0x21a   : > { %848 = vadd.xlane.f32.xlu0 %v847_v43 }
 0x21e   : > { %854 = vadd.xlane.f32.xlu0 %v853_v44 }
 0x222   : > { %860 = vadd.xlane.f32.xlu0 %v859_v45 }
 0x223   : > { %1278 = shalt.err (!%p1275_p5)
}
 0x224   : > { %s1279_s2 = scalar_lea.hbm %s928_s20, 128  ;;  %s1283_s17 = scalar_lea.hbm %s1891_s4, 256 }
 0x225   : > { %p1280_p6 = scmp.ne.s32.totalorder %s928_s20, %s1279_s2  ;;  %p1284_p10 = scmp.lt.s32.totalorder %s928_s20, %s1891_s4 }
 0x226   : > { %p1285_p11 = scmp.lt.s32.totalorder %s1283_s17, %s1279_s2 }
 0x227   : > { %p1281_p7 = pnand %p1280_p6, %p1459_p4 }
 0x228   : > { %p1286_p12 = por %p1285_p11, %p1284_p10 }
 0x229   : > { %p1282_p9 = pneg %p1281_p7 }
 0x22b   : > { %p1287_p13 = pnand %p1286_p12, %p1282_p9 }
 0x22d   : > { %1290 = shalt.err (!%p1287_p13)
}
 0x22e   : > { %1198 = dma.vmem_to_hbm [thread:$0]  (%p1459_p4), %s931_s21, 128, %s928_s20, %s894_s22  }
 0x22f   : > { %s1195_s0 = sshll.u32 %s1363_s27, 5  ;;  %s946_s1 = sshll.u32 %s1778_s18, 4  ;;  %s947_s1 = int_to_ptr.vmem [resolvable:$true] %s946_s1 }
 0x230   : > { %s944_s10 = scalar_lea.hbm %s1892_s5, %s1195_s0  ;;  %s899_s3 = scalar_lea.sflag [#allocation5], %s1713_s16 }
 0x231   : > { %s1291_s12 = scalar_lea.vmem %s947_s1, 32  ;;  %s1378_s2 = smov [#allocation4]  }
 0x232   : > { %p1292_p0 = scmp.ne.s32.totalorder %s947_s1, %s1291_s12  ;;  %s1295_s17 = sshll.u32 %s1378_s2, 4  ;;  %s1296_s17 = int_to_ptr.vmem [resolvable:$false] %s1295_s17 }
 0x233   : > { %s1297_s19 = scalar_lea.vmem %s1296_s17, 64  ;;  %p1298_p3 = scmp.lt.s32.totalorder %s947_s1, %s1296_s17 }
 0x234   : > { %p1293_p1 = pnand %p1292_p0, %p1459_p4  ;;  %p1299_p5 = scmp.lt.s32.totalorder %s1297_s19, %s1291_s12 }
 0x236   : > { %p1294_p2 = pneg %p1293_p1  ;;  %p1300_p6 = por %p1299_p5, %p1298_p3 }
 0x238   : > { %p1301_p7 = pnand %p1300_p6, %p1294_p2 }
 0x23a   : > { %1304 = shalt.err (!%p1301_p7)
}
 0x23b   : > { %s1305_s27 = scalar_lea.hbm %s944_s10, 32  ;;  %s1309_s20 = scalar_lea.hbm %s1892_s5, 64 }
 0x23c   : > { %p1306_p9 = scmp.ne.s32.totalorder %s944_s10, %s1305_s27  ;;  %p1310_p12 = scmp.lt.s32.totalorder %s944_s10, %s1892_s5 }
 0x23d   : > { %p1311_p13 = scmp.lt.s32.totalorder %s1309_s20, %s1305_s27 }
 0x23e   : > { %p1307_p10 = pnand %p1306_p9, %p1459_p4 }
 0x23f   : > { %p1312_p0 = por %p1311_p13, %p1310_p12 }
 0x240   : > { %p1308_p11 = pneg %p1307_p10 }
 0x242   : > { %p1313_p1 = pnand %p1312_p0, %p1308_p11 }
 0x244   : > { %1316 = shalt.err (!%p1313_p1)
}
 0x245   : > { %1199 = dma.vmem_to_hbm [thread:$0]  (%p1459_p4), %s947_s1, 32, %s944_s10, %s899_s3   ;;  %vm891_vm11 = vcmask 0  }
 0x246   : > { %s359_s1 = scalar_lea.vmem %s1894_s7, %s1478_s15 }
 0x29b   : > { %v882_v6 = vpop.xlane.xlu0 %881 }
 0x29c   : > { %v883_v54 = vrot.slane %v882_v6, 4 }
 0x29e   : > { %v884_v59 = vadd.f32 %v883_v54, %v882_v6 }
 0x29f   : > { %v846_v60 = vpop.xlane.xlu0 %845 }
 0x2a0   : > { %v885_v61 = vrot.slane %v884_v59, 2  ;;  %867 = vst.msk [vmem:[%s1804_s30 + $0x8] sm:$0xff] %vm865_vm0, %v846_v60 }
 0x2a2   : > { %v886_v62 = vadd.f32 %v885_v61, %v884_v59 }
 0x2a3   : > { %v849_v63 = vpop.xlane.xlu0 %848 }
 0x2a4   : > { %868 = vst.msk [vmem:[%s1804_s30 + $0x10] sm:$0xff] %vm865_vm0, %v849_v63  ;;  %v887_v1 = vrot.slane %v886_v62, 1 }
 0x2a6   : > { %v888_v2 = vadd.f32 %v887_v1, %v886_v62 }
 0x2a7   : > { %v855_v3 = vpop.xlane.xlu0 %854 }
 0x2a8   : > { %870 = vst.msk [vmem:[%s1804_s30 + $0x20] sm:$0xff] %vm865_vm0, %v855_v3 }
 0x2a9   : > { %1196 = vpush %v888_v2 }
 0x2ab   : > { %v861_v4 = vpop.xlane.xlu0 %860 }
 0x2ac   : > { %872 = vst.msk [vmem:[%s1804_s30 + $0x30] sm:$0xff] %vm865_vm0, %v861_v4 }
 0x2da   : > { %s1197_s23 = spop %1196 }
 0x2db   : > { %v890_v5 = vstv %s1197_s23 }
 0x2dc   : > { %892 = vst.msk [vmem:[%s359_s1] sm:$0x1] %vm891_vm11, %v890_v5 }
 0x2dd PF: > { %p1209_p4 = scmp.ge.s32.totalorder %s1371_s29, 2  ;;  %s964_s8 = sand.u32 1, %s1351_s24  }
 0x2de   : > { %s965_s10 = scalar_lea.sflag [#allocation3], %s964_s8 }
 0x2df   : > { %p1203_p2 = pnand %p1209_p4, %p1466_p8 }
 0x2e1   : > { %p1204_p3 = pneg %p1203_p2 }
 0x2e3   : > { %1342 = dma.done.wait (%p1204_p3), %s965_s10, 128  }
 0x2e4   : > { %1344 = vsyncadd (%p1204_p3), %s965_s10, 4294967168  ;;  %s974_s30 = scalar_lea.sflag [#allocation5], %s964_s8 }
 0x2e5   : > { %1346 = dma.done.wait (%p1204_p3), %s974_s30, 32  }
 0x2e6   : > { %1348 = vsyncadd (%p1204_p3), %s974_s30, 4294967264  ;;  %s24_s29 = sadd.s32 1, %s1371_s29   ;;  %s1908_s24 = smov %s1355_s25 }
 0x2e7   : > { %p21_p5 = scmp.ge.s32.totalorder %s24_s29, 4   ;;  %s1909_s25 = smov %s1359_s26 }
 0x2e8   : > { %s1910_s26 = smov %s1472_s14  ;;  %s1911_s27 = smov %s1367_s28 }
 0x2e9   : > { %s1912_s28 = smov %s1914_s9  ;;  %23 = sbr.rel (!%p21_p5) target bundleno = 11 (0xb), region = 112 }
 0x2ee   :  { %1000 = vsyncpa [#allocation3], 1 }
 0x2ef   :  { %1002 = vsyncpa [#allocation3 + $0x1], 1 }
 0x2f0   :  { %1003 = vsyncpa [#allocation5], 1 }
 0x2f1   :  { %1005 = vsyncpa [#allocation5 + $0x1], 1 }

</bundles_post_ra>
